<compile_context>
chip_gen: v7x
topology: tpu7x:2x2x1
jax: 0.10.0
libtpu: 0.0.40
codegen_flags: <defaults>
</compile_context>

<pallas_src>
import functools

import jax
import jax.numpy as jnp
from jax.experimental import pallas as pl
from jax.experimental.pallas import tpu as pltpu


def _round_up(v, m):
    return ((v + m - 1) // m) * m


def _patch_loss_kernel(x1_ref, x2_ref, wt_ref, side_ref, out_ref,
                       *, s, m_s, m_l, n_valid, c_valid, use_bf16):
    tn = x1_ref.shape[0]
    cp = wt_ref.shape[1]

    def normalize(x):
        # F.normalize(x, dim=1): x / max(||x||, 1e-12) == x * rsqrt(max(||x||^2, 1e-24))
        sumsq = jnp.sum(x * x, axis=1, keepdims=True)
        return x * jax.lax.rsqrt(jnp.maximum(sumsq, 1e-24))   # single EUP op

    side = side_ref[...]                                  # (TN, 2) int32
    lab = side[:, 0:1]                                    # label indices
    spoof = side[:, 1:2]                                  # is_spoof in {0,1}

    col = jax.lax.broadcasted_iota(jnp.int32, (tn, cp), 1)
    onehot = col == lab                                   # label one-hot, no gather
    m = jnp.where(spoof == 0, jnp.float32(m_s), jnp.float32(m_l))   # (TN, 1)
    # excl always drops column 0 (is_spoof[i].argmax()==0 for a 1-D 0/1 tensor);
    # also drop zero-padded columns >= c_valid.
    excl_mask = jnp.logical_and(col >= 1, col < c_valid)

    row = jax.lax.broadcasted_iota(jnp.int32, (tn, 1), 0)
    rmask = (pl.program_id(0) * tn + row) < n_valid       # mask padded rows

    mat_dtype = jnp.bfloat16 if use_bf16 else jnp.float32
    wt = wt_ref[...].astype(mat_dtype)                    # (Dp, Cp), VMEM-resident

    def amsm_partial(x_n):
        # wf / exp temporaries are local so the first pass's (TN, Cp) arrays are
        # dead before the second matmul runs (smaller live set -> fewer spills).
        wf = jnp.dot(x_n.astype(mat_dtype), wt,
                     preferred_element_type=jnp.float32)  # (TN, Cp) f32
        sel = jnp.sum(jnp.where(onehot, wf, 0.0), axis=1, keepdims=True)
        num = s * (sel - m)
        excl = jnp.sum(jnp.where(excl_mask, jnp.exp(s * wf), 0.0),
                       axis=1, keepdims=True)
        L = num - jnp.log(jnp.exp(num) + excl)            # (TN, 1)
        return jnp.sum(jnp.where(rmask, L, 0.0))

    x1n = normalize(x1_ref[...])                          # (TN, Dp) f32
    sum_l1 = amsm_partial(x1n)
    x2n = normalize(x2_ref[...])
    sum_l2 = amsm_partial(x2n)

    d = x1n - x2n
    sq = jnp.sum(d * d, axis=1, keepdims=True)            # padded cols contribute 0
    sum_sq = jnp.sum(jnp.where(rmask, sq, 0.0))

    # lane-dense (8,128) partial-sum block (unmasked vst):
    #   [0,0]=sum L1, [0,1]=sum L2, [0,2]=sum ||x1n - x2n||^2
    r8 = jax.lax.broadcasted_iota(jnp.int32, (8, 128), 0)
    c8 = jax.lax.broadcasted_iota(jnp.int32, (8, 128), 1)
    row0 = r8 == 0
    out_ref[...] = (jnp.where(jnp.logical_and(row0, c8 == 0), sum_l1, 0.0)
                    + jnp.where(jnp.logical_and(row0, c8 == 1), sum_l2, 0.0)
                    + jnp.where(jnp.logical_and(row0, c8 == 2), sum_sq, 0.0))


def _pick_row_tile(n_rows8, tile_n):
    """Row-tile selection: big tiles to amortize per-step overhead, preferring a
    tile that divides the 8-rounded batch (no padded x copies) and >=2 tiles on
    large batches so v7x's two TensorCores both get work."""
    cand = max(8, min(_round_up(tile_n, 8), n_rows8))
    # Keep >=2 "parallel" tiles once the batch is big enough (each tile >=256
    # rows); harmless on single-TensorCore v5e/v6e.
    if cand >= n_rows8 and n_rows8 >= 512:
        cand = max(8, _round_up(n_rows8 // 2, 8))
    # Prefer a divisor of n_rows8 so the wrapper never materializes row padding,
    # but don't shrink the tile by more than 2x looking for one.
    t = cand
    while t >= 8:
        if n_rows8 % t == 0:
            return t
        if cand - t > cand // 2:
            break
        t -= 8
    return cand


def patch_loss(x1, x2, label_onehot, is_spoof, weight,
               s=30.0, m_l=0.4, m_s=0.1, alpha1=1.0, alpha2=1.0,
               tile_n=1024, use_bf16_matmul=False):
    """x1, x2: (N, D) f32; label_onehot: (N, C); is_spoof: (N,) in {0,1};
    weight: (C, D) f32 (nn.Linear layout). Returns scalar f32 loss."""
    x1 = x1.astype(jnp.float32)
    x2 = x2.astype(jnp.float32)
    N, D = x1.shape
    C = weight.shape[0]

    # argmax(label, dim=1) done once here (matches the reference); the kernel
    # never touches the dense (N, C) one-hot. label + is_spoof packed into one
    # narrow (N, 2) int32 side input -> a single small DMA per grid step.
    label_idx = jnp.argmax(label_onehot, axis=1).astype(jnp.int32)
    side = jnp.stack([label_idx, is_spoof.astype(jnp.int32)], axis=1)

    dp = _round_up(D, 128)      # lane-dense feature dim (PatchLoss D=512 already aligned)
    cp = _round_up(C, 128)      # lane-dense class dim
    n8 = _round_up(N, 8)
    tn = _pick_row_tile(n8, tile_n)
    np_ = _round_up(n8, tn)
    num_tiles = np_ // tn

    def pad2(a, rows, cols):
        pr, pc = rows - a.shape[0], cols - a.shape[1]
        return a if (pr == 0 and pc == 0) else jnp.pad(a, ((0, pr), (0, pc)))

    x1p = pad2(x1, np_, dp)     # usually a no-op: D multiple of 128, tn | n8
    x2p = pad2(x2, np_, dp)
    wtp = pad2(weight.astype(jnp.float32).T, dp, cp)      # (Dp, Cp)
    sidep = pad2(side, np_, 2)

    # Footprint-derived scoped-VMEM limit: x1/x2 tiles double-buffered, resident
    # weight, small side/out blocks, plus (TN,Cp)/(TN,Dp) temporaries, with 1.5x
    # headroom; clamped below v7x's 64 MiB physical VMEM (v5e/v6e have 128 MiB).
    est = (2 * 2 * tn * dp * 4          # x1, x2 tiles (2 buffers each)
           + dp * cp * 4                # weight (single buffer)
           + 2 * tn * 2 * 4             # packed side input
           + 2 * 8 * 128 * 4            # output partials
           + 4 * tn * cp * 4            # wf / exp / mask temporaries
           + 3 * tn * dp * 4)           # x1n / x2n / diff
    vmem_bytes = int(min(max(est * 3 // 2, 16 * 1024 * 1024), 56 * 1024 * 1024))

    # Constant-index weight: single-buffer it once it is big enough to matter
    # (halves its VMEM footprint at large C); plain spec for tiny weights.
    w_idx = lambda i: (0, 0)
    if dp * cp * 4 > (2 << 20):
        w_spec = pl.BlockSpec((dp, cp), w_idx, pipeline_mode=pl.Buffered(1))
    else:
        w_spec = pl.BlockSpec((dp, cp), w_idx)

    kernel = functools.partial(_patch_loss_kernel,
                               s=float(s), m_s=float(m_s), m_l=float(m_l),
                               n_valid=N, c_valid=C,
                               use_bf16=bool(use_bf16_matmul))

    partials = pl.pallas_call(
        kernel,
        out_shape=jax.ShapeDtypeStruct((num_tiles * 8, 128), jnp.float32),
        grid=(num_tiles,),
        in_specs=[
            pl.BlockSpec((tn, dp), lambda i: (i, 0)),     # x1 tile (streamed)
            pl.BlockSpec((tn, dp), lambda i: (i, 0)),     # x2 tile (streamed)
            w_spec,                                       # W.T, VMEM-resident
            pl.BlockSpec((tn, 2), lambda i: (i, 0)),      # [label_idx, is_spoof]
        ],
        out_specs=pl.BlockSpec((8, 128), lambda i: (i, 0)),
        compiler_params=pltpu.CompilerParams(
            dimension_semantics=("parallel",),            # batch tiles -> both TCs on v7x
            vmem_limit_bytes=vmem_bytes),
    )(x1p, x2p, wtp, sidep)

    totals = jnp.sum(partials, axis=0)                    # (128,)
    amsm1 = -totals[0] / N
    amsm2 = -totals[1] / N
    sim = totals[2] / (N * D)
    return alpha1 * sim + alpha2 * (amsm1 + amsm2)


def _reference(x1, x2, label_onehot, is_spoof, weight,
               s=30.0, m_l=0.4, m_s=0.1, alpha1=1.0, alpha2=1.0):
    # Pure-JAX reference mirroring the PyTorch PatchLoss forward exactly.
    def normalize(x):
        return x / jnp.maximum(jnp.linalg.norm(x, axis=1, keepdims=True), 1e-12)

    def amsm(x):
        x_n = normalize(x)
        wf = x_n @ weight.T                               # un-normalized W (quirk)
        label_idx = jnp.argmax(label_onehot, axis=1)
        m = jnp.where(is_spoof == 0, m_s, m_l).astype(jnp.float32)
        numerator = s * (wf[jnp.arange(x.shape[0]), label_idx] - m)
        excl = wf[:, 1:]                                  # is_spoof[i].argmax()==0 always
        denom = jnp.exp(numerator) + jnp.sum(jnp.exp(s * excl), axis=1)
        L = numerator - jnp.log(denom)
        return -jnp.mean(L)

    a1 = amsm(x1)
    a2 = amsm(x2)
    sim = jnp.mean((normalize(x1) - normalize(x2)) ** 2)
    return alpha1 * sim + alpha2 * (a1 + a2)


if __name__ == "__main__":
    N, in_features, num_classes = 16, 512, 10             # PatchLoss uses 512 features
    key = jax.random.PRNGKey(0)
    k1, k2, kw, kl, ks = jax.random.split(key, 5)

    x1 = jax.random.normal(k1, (N, in_features), dtype=jnp.float32)
    x2 = jax.random.normal(k2, (N, in_features), dtype=jnp.float32)
    # nn.Linear(in_features, num_classes, bias=False) weight: (out, in)
    bound = 1.0 / (in_features ** 0.5)
    W = jax.random.uniform(kw, (num_classes, in_features),
                           minval=-bound, maxval=bound, dtype=jnp.float32)
    label_idx = jax.random.randint(kl, (N,), 0, num_classes)
    label_onehot = jax.nn.one_hot(label_idx, num_classes, dtype=jnp.float32)
    is_spoof = jax.random.randint(ks, (N,), 0, 2).astype(jnp.int32)

    loss = patch_loss(x1, x2, label_onehot, is_spoof, W)
    loss = jax.block_until_ready(loss)

    ref = _reference(x1, x2, label_onehot, is_spoof, W)
    assert jnp.allclose(loss, ref, rtol=5e-5, atol=5e-5), (loss, ref)

    print("KERNEL_OK")
</pallas_src>

<mosaic_0001>
module attributes {stable_mosaic.version = 11 : i64} {
  func.func @_patch_loss_kernel(%arg0: i32, %arg1: memref<16x512xf32, #tpu.memory_space<vmem>>, %arg2: memref<16x512xf32, #tpu.memory_space<vmem>>, %arg3: memref<512x128xf32, #tpu.memory_space<vmem>>, %arg4: memref<16x2xi32, #tpu.memory_space<vmem>>, %arg5: memref<8x128xf32, #tpu.memory_space<vmem>>) attributes {dimension_semantics = [#tpu.dimension_semantics<parallel>], iteration_bounds = array<i64: 1>, scalar_prefetch = 0 : i64, scratch_operands = 0 : i64, tpu.core_type = #tpu.core_type<tc>, window_params = [{transform_indices = @transform_0, window_bounds = array<i64: 16, 512>}, {transform_indices = @transform_1, window_bounds = array<i64: 16, 512>}, {pipeline_mode = #tpu.pipeline_mode<synchronous>, transform_indices = @transform_2, window_bounds = array<i64: 512, 128>}, {transform_indices = @transform_3, window_bounds = array<i64: 16, 2>}, {transform_indices = @transform_4, window_bounds = array<i64: 8, 128>}]} {
    %c0 = arith.constant 0 : index
    %c0_0 = arith.constant 0 : index
    %0 = vector.load %arg4[%c0, %c0_0] : memref<16x2xi32, #tpu.memory_space<vmem>>, vector<16x2xi32>
    %1 = vector.extract_strided_slice %0 {offsets = [0, 0], sizes = [16, 1], strides = [1, 1]} : vector<16x2xi32> to vector<16x1xi32>
    %2 = vector.extract_strided_slice %0 {offsets = [0, 1], sizes = [16, 1], strides = [1, 1]} : vector<16x2xi32> to vector<16x1xi32>
    %3 = tpu.iota {dimensions = array<i32: 1>} : vector<16x128xi32>
    %4 = vector.broadcast %1 : vector<16x1xi32> to vector<16x128xi32>
    %5 = arith.cmpi eq, %3, %4 : vector<16x128xi32>
    %c0_i32 = arith.constant 0 : i32
    %6 = vector.broadcast %c0_i32 : i32 to vector<16x1xi32>
    %7 = arith.cmpi eq, %2, %6 : vector<16x1xi32>
    %cst = arith.constant 1.000000e-01 : f32
    %cst_1 = arith.constant 4.000000e-01 : f32
    %8 = vector.broadcast %cst : f32 to vector<16x1xf32>
    %9 = vector.broadcast %cst_1 : f32 to vector<16x1xf32>
    %10 = arith.select %7, %8, %9 : vector<16x1xi1>, vector<16x1xf32>
    %c1_i32 = arith.constant 1 : i32
    %11 = vector.broadcast %c1_i32 : i32 to vector<16x128xi32>
    %12 = arith.cmpi sge, %3, %11 : vector<16x128xi32>
    %c10_i32 = arith.constant 10 : i32
    %13 = vector.broadcast %c10_i32 : i32 to vector<16x128xi32>
    %14 = arith.cmpi slt, %3, %13 : vector<16x128xi32>
    %15 = arith.andi %12, %14 : vector<16x128xi1>
    %16 = tpu.iota {dimensions = array<i32: 0>} : vector<16x1xi32>
    %c16_i32 = arith.constant 16 : i32
    %17 = arith.muli %arg0, %c16_i32 : i32
    %18 = vector.broadcast %17 : i32 to vector<16x1xi32>
    %19 = arith.addi %18, %16 : vector<16x1xi32>
    %c16_i32_2 = arith.constant 16 : i32
    %20 = vector.broadcast %c16_i32_2 : i32 to vector<16x1xi32>
    %21 = arith.cmpi slt, %19, %20 : vector<16x1xi32>
    %c0_3 = arith.constant 0 : index
    %c0_4 = arith.constant 0 : index
    %22 = vector.load %arg3[%c0_3, %c0_4] : memref<512x128xf32, #tpu.memory_space<vmem>>, vector<512x128xf32>
    %c0_5 = arith.constant 0 : index
    %c0_6 = arith.constant 0 : index
    %23 = vector.load %arg1[%c0_5, %c0_6] : memref<16x512xf32, #tpu.memory_space<vmem>>, vector<16x512xf32>
    %24 = arith.mulf %23, %23 : vector<16x512xf32>
    %cst_7 = arith.constant dense<0.000000e+00> : vector<16xf32>
    %25 = vector.multi_reduction <add>, %24, %cst_7 [1] : vector<16x512xf32> to vector<16xf32>
    %26 = vector.shape_cast %25 : vector<16xf32> to vector<16x1xf32>
    %cst_8 = arith.constant 1.000000e-24 : f32
    %27 = vector.broadcast %cst_8 : f32 to vector<16x1xf32>
    %28 = arith.maximumf %26, %27 : vector<16x1xf32>
    %29 = math.rsqrt %28 : vector<16x1xf32>
    %30 = vector.broadcast %29 : vector<16x1xf32> to vector<16x512xf32>
    %31 = arith.mulf %23, %30 : vector<16x512xf32>
    %cst_9 = arith.constant dense<0.000000e+00> : vector<16x128xf32>
    %32 = tpu.matmul %31, %22, %cst_9 {dimension_numbers = #tpu.dot_dimension_numbers<[1], [0], [0], [1], [0, 0, 1, 1], [], []>} : vector<16x512xf32>, vector<512x128xf32>, vector<16x128xf32> -> vector<16x128xf32>
    %cst_10 = arith.constant 0.000000e+00 : f32
    %33 = vector.broadcast %cst_10 : f32 to vector<16x128xf32>
    %34 = arith.select %5, %32, %33 : vector<16x128xi1>, vector<16x128xf32>
    %cst_11 = arith.constant dense<0.000000e+00> : vector<16xf32>
    %35 = vector.multi_reduction <add>, %34, %cst_11 [1] : vector<16x128xf32> to vector<16xf32>
    %36 = vector.shape_cast %35 : vector<16xf32> to vector<16x1xf32>
    %37 = arith.subf %36, %10 : vector<16x1xf32>
    %cst_12 = arith.constant 3.000000e+01 : f32
    %38 = vector.broadcast %cst_12 : f32 to vector<16x1xf32>
    %39 = arith.mulf %38, %37 : vector<16x1xf32>
    %cst_13 = arith.constant 3.000000e+01 : f32
    %40 = vector.broadcast %cst_13 : f32 to vector<16x128xf32>
    %41 = arith.mulf %40, %32 : vector<16x128xf32>
    %42 = math.exp %41 : vector<16x128xf32>
    %cst_14 = arith.constant 0.000000e+00 : f32
    %43 = vector.broadcast %cst_14 : f32 to vector<16x128xf32>
    %44 = arith.select %15, %42, %43 : vector<16x128xi1>, vector<16x128xf32>
    %cst_15 = arith.constant dense<0.000000e+00> : vector<16xf32>
    %45 = vector.multi_reduction <add>, %44, %cst_15 [1] : vector<16x128xf32> to vector<16xf32>
    %46 = vector.shape_cast %45 : vector<16xf32> to vector<16x1xf32>
    %47 = math.exp %39 : vector<16x1xf32>
    %48 = arith.addf %47, %46 : vector<16x1xf32>
    %49 = math.log %48 : vector<16x1xf32>
    %50 = arith.subf %39, %49 : vector<16x1xf32>
    %cst_16 = arith.constant 0.000000e+00 : f32
    %51 = vector.broadcast %cst_16 : f32 to vector<16x1xf32>
    %52 = arith.select %21, %50, %51 : vector<16x1xi1>, vector<16x1xf32>
    %53 = vector.shape_cast %52 : vector<16x1xf32> to vector<1x16x1xf32>
    %cst_17 = arith.constant dense<0.000000e+00> : vector<1xf32>
    %54 = vector.multi_reduction <add>, %53, %cst_17 [1, 2] : vector<1x16x1xf32> to vector<1xf32>
    %55 = vector.shape_cast %54 : vector<1xf32> to vector<1x1x1xf32>
    %56 = vector.extract %55[0, 0, 0] : f32 from vector<1x1x1xf32>
    %c0_18 = arith.constant 0 : index
    %c0_19 = arith.constant 0 : index
    %57 = vector.load %arg2[%c0_18, %c0_19] : memref<16x512xf32, #tpu.memory_space<vmem>>, vector<16x512xf32>
    %58 = arith.mulf %57, %57 : vector<16x512xf32>
    %cst_20 = arith.constant dense<0.000000e+00> : vector<16xf32>
    %59 = vector.multi_reduction <add>, %58, %cst_20 [1] : vector<16x512xf32> to vector<16xf32>
    %60 = vector.shape_cast %59 : vector<16xf32> to vector<16x1xf32>
    %cst_21 = arith.constant 1.000000e-24 : f32
    %61 = vector.broadcast %cst_21 : f32 to vector<16x1xf32>
    %62 = arith.maximumf %60, %61 : vector<16x1xf32>
    %63 = math.rsqrt %62 : vector<16x1xf32>
    %64 = vector.broadcast %63 : vector<16x1xf32> to vector<16x512xf32>
    %65 = arith.mulf %57, %64 : vector<16x512xf32>
    %cst_22 = arith.constant dense<0.000000e+00> : vector<16x128xf32>
    %66 = tpu.matmul %65, %22, %cst_22 {dimension_numbers = #tpu.dot_dimension_numbers<[1], [0], [0], [1], [0, 0, 1, 1], [], []>} : vector<16x512xf32>, vector<512x128xf32>, vector<16x128xf32> -> vector<16x128xf32>
    %cst_23 = arith.constant 0.000000e+00 : f32
    %67 = vector.broadcast %cst_23 : f32 to vector<16x128xf32>
    %68 = arith.select %5, %66, %67 : vector<16x128xi1>, vector<16x128xf32>
    %cst_24 = arith.constant dense<0.000000e+00> : vector<16xf32>
    %69 = vector.multi_reduction <add>, %68, %cst_24 [1] : vector<16x128xf32> to vector<16xf32>
    %70 = vector.shape_cast %69 : vector<16xf32> to vector<16x1xf32>
    %71 = arith.subf %70, %10 : vector<16x1xf32>
    %cst_25 = arith.constant 3.000000e+01 : f32
    %72 = vector.broadcast %cst_25 : f32 to vector<16x1xf32>
    %73 = arith.mulf %72, %71 : vector<16x1xf32>
    %cst_26 = arith.constant 3.000000e+01 : f32
    %74 = vector.broadcast %cst_26 : f32 to vector<16x128xf32>
    %75 = arith.mulf %74, %66 : vector<16x128xf32>
    %76 = math.exp %75 : vector<16x128xf32>
    %cst_27 = arith.constant 0.000000e+00 : f32
    %77 = vector.broadcast %cst_27 : f32 to vector<16x128xf32>
    %78 = arith.select %15, %76, %77 : vector<16x128xi1>, vector<16x128xf32>
    %cst_28 = arith.constant dense<0.000000e+00> : vector<16xf32>
    %79 = vector.multi_reduction <add>, %78, %cst_28 [1] : vector<16x128xf32> to vector<16xf32>
    %80 = vector.shape_cast %79 : vector<16xf32> to vector<16x1xf32>
    %81 = math.exp %73 : vector<16x1xf32>
    %82 = arith.addf %81, %80 : vector<16x1xf32>
    %83 = math.log %82 : vector<16x1xf32>
    %84 = arith.subf %73, %83 : vector<16x1xf32>
    %cst_29 = arith.constant 0.000000e+00 : f32
    %85 = vector.broadcast %cst_29 : f32 to vector<16x1xf32>
    %86 = arith.select %21, %84, %85 : vector<16x1xi1>, vector<16x1xf32>
    %87 = vector.shape_cast %86 : vector<16x1xf32> to vector<1x16x1xf32>
    %cst_30 = arith.constant dense<0.000000e+00> : vector<1xf32>
    %88 = vector.multi_reduction <add>, %87, %cst_30 [1, 2] : vector<1x16x1xf32> to vector<1xf32>
    %89 = vector.shape_cast %88 : vector<1xf32> to vector<1x1x1xf32>
    %90 = vector.extract %89[0, 0, 0] : f32 from vector<1x1x1xf32>
    %91 = arith.subf %31, %65 : vector<16x512xf32>
    %92 = arith.mulf %91, %91 : vector<16x512xf32>
    %cst_31 = arith.constant dense<0.000000e+00> : vector<16xf32>
    %93 = vector.multi_reduction <add>, %92, %cst_31 [1] : vector<16x512xf32> to vector<16xf32>
    %94 = vector.shape_cast %93 : vector<16xf32> to vector<16x1xf32>
    %cst_32 = arith.constant 0.000000e+00 : f32
    %95 = vector.broadcast %cst_32 : f32 to vector<16x1xf32>
    %96 = arith.select %21, %94, %95 : vector<16x1xi1>, vector<16x1xf32>
    %97 = vector.shape_cast %96 : vector<16x1xf32> to vector<1x16x1xf32>
    %cst_33 = arith.constant dense<0.000000e+00> : vector<1xf32>
    %98 = vector.multi_reduction <add>, %97, %cst_33 [1, 2] : vector<1x16x1xf32> to vector<1xf32>
    %99 = vector.shape_cast %98 : vector<1xf32> to vector<1x1x1xf32>
    %100 = vector.extract %99[0, 0, 0] : f32 from vector<1x1x1xf32>
    %101 = tpu.iota {dimensions = array<i32: 0>} : vector<8x128xi32>
    %102 = tpu.iota {dimensions = array<i32: 1>} : vector<8x128xi32>
    %c0_i32_34 = arith.constant 0 : i32
    %103 = vector.broadcast %c0_i32_34 : i32 to vector<8x128xi32>
    %104 = arith.cmpi eq, %101, %103 : vector<8x128xi32>
    %c0_i32_35 = arith.constant 0 : i32
    %105 = vector.broadcast %c0_i32_35 : i32 to vector<8x128xi32>
    %106 = arith.cmpi eq, %102, %105 : vector<8x128xi32>
    %107 = arith.andi %104, %106 : vector<8x128xi1>
    %cst_36 = arith.constant 0.000000e+00 : f32
    %108 = vector.broadcast %56 : f32 to vector<8x128xf32>
    %109 = vector.broadcast %cst_36 : f32 to vector<8x128xf32>
    %110 = arith.select %107, %108, %109 : vector<8x128xi1>, vector<8x128xf32>
    %c1_i32_37 = arith.constant 1 : i32
    %111 = vector.broadcast %c1_i32_37 : i32 to vector<8x128xi32>
    %112 = arith.cmpi eq, %102, %111 : vector<8x128xi32>
    %113 = arith.andi %104, %112 : vector<8x128xi1>
    %cst_38 = arith.constant 0.000000e+00 : f32
    %114 = vector.broadcast %90 : f32 to vector<8x128xf32>
    %115 = vector.broadcast %cst_38 : f32 to vector<8x128xf32>
    %116 = arith.select %113, %114, %115 : vector<8x128xi1>, vector<8x128xf32>
    %117 = arith.addf %110, %116 : vector<8x128xf32>
    %c2_i32 = arith.constant 2 : i32
    %118 = vector.broadcast %c2_i32 : i32 to vector<8x128xi32>
    %119 = arith.cmpi eq, %102, %118 : vector<8x128xi32>
    %120 = arith.andi %104, %119 : vector<8x128xi1>
    %cst_39 = arith.constant 0.000000e+00 : f32
    %121 = vector.broadcast %100 : f32 to vector<8x128xf32>
    %122 = vector.broadcast %cst_39 : f32 to vector<8x128xf32>
    %123 = arith.select %120, %121, %122 : vector<8x128xi1>, vector<8x128xf32>
    %124 = arith.addf %117, %123 : vector<8x128xf32>
    %c0_40 = arith.constant 0 : index
    %c0_41 = arith.constant 0 : index
    %125 = vector.load %arg5[%c0_40, %c0_41] : memref<8x128xf32, #tpu.memory_space<vmem>>, vector<8x128xf32>
    tpu.vector_store %arg5[%c0_40, %c0_41], %124 {strides = array<i32>} : memref<8x128xf32, #tpu.memory_space<vmem>>, vector<8x128xf32>,
    return
  }
  func.func @transform_0(%arg0: i32) -> (i32, i32) {
    %c0_i32 = arith.constant 0 : i32
    %c0_i32_0 = arith.constant 0 : i32
    return %arg0, %c0_i32 : i32, i32
  }
  func.func @transform_1(%arg0: i32) -> (i32, i32) {
    %c0_i32 = arith.constant 0 : i32
    %c0_i32_0 = arith.constant 0 : i32
    return %arg0, %c0_i32 : i32, i32
  }
  func.func @transform_2(%arg0: i32) -> (i32, i32) {
    %c0_i32 = arith.constant 0 : i32
    %c0_i32_0 = arith.constant 0 : i32
    %c0_i32_1 = arith.constant 0 : i32
    return %c0_i32, %c0_i32_0 : i32, i32
  }
  func.func @transform_3(%arg0: i32) -> (i32, i32) {
    %c0_i32 = arith.constant 0 : i32
    %c0_i32_0 = arith.constant 0 : i32
    return %arg0, %c0_i32 : i32, i32
  }
  func.func @transform_4(%arg0: i32) -> (i32, i32) {
    %c0_i32 = arith.constant 0 : i32
    %c0_i32_0 = arith.constant 0 : i32
    return %arg0, %c0_i32 : i32, i32
  }
}

</mosaic_0001>

<bundles_post_ra>
// kernel: tpu_custom_call.1
= control target key start
LH: loop header
LB: loop body
LE: loop exit
PB: predicated region body
PF: predicated region fallthrough
CT: control target
= control target key end

     0   :  { %9 = vsyncpa [#allocation3], 0  ;;  %s1492_s0 = inlined_call_operand.hbm [shape: f32[16,512], index: 0, kind: input, shape index: {}]   ;;  %s1493_s1 = inlined_call_operand.hbm [shape: f32[16,512], index: 1, kind: input, shape index: {}]   ;;  %s1494_s2 = inlined_call_operand.hbm [shape: f32[512,128], index: 2, kind: input, shape index: {}]   ;;  %s1495_s3 = inlined_call_operand.vmem [shape: s32[16,2], index: 3, kind: input, shape index: {}]   ;;  %s1496_s4 = inlined_call_operand.hbm [shape: f32[8,128], index: 4, kind: output, shape index: {}]  }
   0x1   :  { %10 = vsyncpa [#allocation6], 0 }
   0x2   :  { %11 = vsyncpa [#allocation4], 0  ;;  %s1137_s15 = smov [#allocation5]   ;;  %s1138_s17 = smov [#allocation2]  }
   0x3   :  { %s29_s16 = sshll.u32 %s1137_s15, 4  ;;  %s17_s18 = sshll.u32 %s1138_s17, 4  ;;  %s30_s16 = int_to_ptr.vmem [resolvable:$true] %s29_s16  ;;  %s1173_s18 = int_to_ptr.vmem [resolvable:$true] %s17_s18 }
   0x4   :  { %s1043_s21 = scalar_lea.hbm %s1493_s1, 1024 }
   0x5   :  { %p1044_p0 = scmp.ne.s32.totalorder %s1493_s1, %s1043_s21  ;;  %p1047_p1 = scmp.lt.u32.totalorder %s1043_s21, %s1493_s1 }
   0x7   :  { %p1049_p2 = pnand %p1047_p1, %p1044_p0 }
   0x9   :  { %1052 = shalt.err (!%p1049_p2)
}
   0xa   :  { %s1053_s26 = scalar_lea.vmem %s30_s16, 1024  ;;  %p1058_p4 = scmp.lt.s32.totalorder %s30_s16, %s30_s16 }
   0xb   :  { %p1054_p3 = scmp.ne.s32.totalorder %s30_s16, %s1053_s26  ;;  %p1059_p5 = scmp.lt.s32.totalorder %s1053_s26, %s1053_s26 }
   0xd   :  { %p1060_p6 = por %p1059_p5, %p1058_p4 }
   0xf   :  { %p1061_p7 = pnand %p1060_p6, %p1054_p3 }
  0x11   :  { %1064 = shalt.err (!%p1061_p7)
}
  0x12   :  { %s1139_s27 = smov 512   ;;  %s1140_s28 = smov 32  }
  0x13   :  { %35 = dma.hbm_to_vmem [thread:$0]  %s1493_s1, 1024, %s30_s16, [#allocation6], %s1139_s27, %s1139_s27, %s1140_s28  }
  0x14   :  { %s1065_s7 = scalar_lea.hbm %s1492_s0, 1024 }
  0x15   :  { %p1066_p8 = scmp.ne.s32.totalorder %s1492_s0, %s1065_s7  ;;  %p1069_p9 = scmp.lt.u32.totalorder %s1065_s7, %s1492_s0 }
  0x17   :  { %p1071_p10 = pnand %p1069_p9, %p1066_p8 }
  0x19   :  { %1074 = shalt.err (!%p1071_p10)
}
  0x1a   :  { %s1075_s12 = scalar_lea.vmem %s1173_s18, 1024  ;;  %p1080_p12 = scmp.lt.s32.totalorder %s1173_s18, %s1173_s18 }
  0x1b   :  { %p1076_p11 = scmp.ne.s32.totalorder %s1173_s18, %s1075_s12  ;;  %p1081_p13 = scmp.lt.s32.totalorder %s1075_s12, %s1075_s12 }
  0x1d   :  { %p1082_p0 = por %p1081_p13, %p1080_p12 }
  0x1f   :  { %p1083_p1 = pnand %p1082_p0, %p1076_p11 }
  0x21   :  { %1086 = shalt.err (!%p1083_p1)
}
  0x22   :  { %23 = dma.hbm_to_vmem [thread:$0]  %s1492_s0, 1024, %s1173_s18, [#allocation3], %s1139_s27, %s1139_s27, %s1140_s28  }
  0x23   :  { %s1141_s14 = smov [#allocation7]   ;;  %s1087_s19 = scalar_lea.hbm %s1494_s2, 8192 }
  0x24   :  { %s41_s15 = sshll.u32 %s1141_s14, 4  ;;  %p1088_p2 = scmp.ne.s32.totalorder %s1494_s2, %s1087_s19  ;;  %s42_s15 = int_to_ptr.vmem [resolvable:$true] %s41_s15 }
  0x25   :  { %p1091_p3 = scmp.lt.u32.totalorder %s1087_s19, %s1494_s2 }
  0x27   :  { %p1093_p4 = pnand %p1091_p3, %p1088_p2 }
  0x29   :  { %1096 = shalt.err (!%p1093_p4)
}
  0x2a   :  { %s1097_s24 = scalar_lea.vmem %s42_s15, 8192  ;;  %p1102_p6 = scmp.lt.s32.totalorder %s42_s15, %s42_s15 }
  0x2b   :  { %p1098_p5 = scmp.ne.s32.totalorder %s42_s15, %s1097_s24  ;;  %p1103_p7 = scmp.lt.s32.totalorder %s1097_s24, %s1097_s24 }
  0x2d   :  { %p1104_p8 = por %p1103_p7, %p1102_p6 }
  0x2f   :  { %p1105_p9 = pnand %p1104_p8, %p1098_p5 }
  0x31   :  { %1108 = shalt.err (!%p1105_p9)
}
  0x32   :  { %s1142_s0 = smov 128   ;;  %s1143_s18 = smov 8  }
  0x33   :  { %47 = dma.hbm_to_vmem [thread:$0]  %s1494_s2, 8192, %s42_s15, [#allocation6], %s1142_s0, %s1142_s0, %s1143_s18  }
  0x34   :  { %1131 = dma.done.wait [#allocation3], 1024  }
  0x35   :  { %1132 = vsyncadd [#allocation3], 4294966272 }
  0x36   :  { %1133 = dma.done.wait [#allocation6], 9216  }
  0x37   :  { %1134 = vsyncadd [#allocation6], 4294958080  ;;  %v1216_v0 = vld [vmem:[#allocation5] sm:$0xff]  ;;  %v1218_v1 = vld [vmem:[#allocation5 + $0x8] sm:$0xff]  ;;  %vm383_vm7 = vcmask 7168   ;;  %s1147_s7 = smov [#allocation8]  }
  0x38   :  { %v1220_v2 = vld [vmem:[#allocation5 + $0x10] sm:$0xff]  ;;  %v1222_v3 = vld [vmem:[#allocation5 + $0x18] sm:$0xff]  ;;  %v404_v4 = vmul.f32 %v1216_v0, %v1216_v0  ;;  %v405_v5 = vmul.f32 %v1218_v1, %v1218_v1  ;;  %v1230_v7 = vld [vmem:[#allocation2] sm:$0xff]  ;;  %s702_s8 = sshll.u32 %s1147_s7, 4  ;;  %s703_s8 = int_to_ptr.vmem [resolvable:$true] %s702_s8 }
  0x39   :  { %v406_v6 = vmul.f32 %v1220_v2, %v1220_v2  ;;  %v1232_v8 = vld [vmem:[#allocation2 + $0x8] sm:$0xff]  ;;  %v1234_v9 = vld [vmem:[#allocation2 + $0x10] sm:$0xff]  ;;  %v1236_v10 = vld [vmem:[#allocation2 + $0x18] sm:$0xff]  ;;  %v159_v11 = vmul.f32 %v1230_v7, %v1230_v7  ;;  %v407_v14 = vmul.f32 %v1222_v3, %v1222_v3  ;;  %s1109_s9 = scalar_lea.vmem %s703_s8, 128  ;;  %p1114_p11 = scmp.lt.s32.totalorder %s703_s8, %s703_s8 }
  0x3a   :  { %v160_v12 = vmul.f32 %v1232_v8, %v1232_v8  ;;  %v1242_v13 = vld [vmem:[#allocation2 + $0x20] sm:$0xff]  ;;  %v412_v15 = vadd.f32 %v405_v5, %v404_v4  ;;  %v161_v16 = vmul.f32 %v1234_v9, %v1234_v9  ;;  %v1248_v17 = vld [vmem:[#allocation2 + $0x28] sm:$0xff]  ;;  %v1250_v18 = vld [vmem:[#allocation2 + $0x30] sm:$0xff]  ;;  %v162_v21 = vmul.f32 %v1236_v10, %v1236_v10  ;;  %p1110_p10 = scmp.ne.s32.totalorder %s703_s8, %s1109_s9  ;;  %p1115_p12 = scmp.lt.s32.totalorder %s1109_s9, %s1109_s9 }
  0x3b   :  { %v1252_v19 = vld [vmem:[#allocation2 + $0x38] sm:$0xff]  ;;  %v163_v20 = vmul.f32 %v1242_v13, %v1242_v13  ;;  %v164_v23 = vmul.f32 %v1248_v17, %v1248_v17  ;;  %v165_v24 = vmul.f32 %v1250_v18, %v1250_v18  ;;  %v1262_v25 = vld [vmem:[#allocation5 + $0x20] sm:$0xff]  ;;  %v1264_v26 = vld [vmem:[#allocation5 + $0x28] sm:$0xff] }
  0x3c   :  { %v167_v22 = vadd.f32 %v160_v12, %v159_v11  ;;  %v1266_v27 = vld [vmem:[#allocation5 + $0x30] sm:$0xff]  ;;  %v413_v28 = vadd.f32 %v412_v15, %v406_v6  ;;  %v1268_v29 = vld [vmem:[#allocation5 + $0x38] sm:$0xff]  ;;  %v408_v30 = vmul.f32 %v1262_v25, %v1262_v25  ;;  %v409_v31 = vmul.f32 %v1264_v26, %v1264_v26  ;;  %v103_v33 = vld [vmem:[#allocation7 + $0x80] sm:$0xff]  ;;  %p1116_p13 = por %p1115_p12, %p1114_p11 }
  0x3d   :  { %v410_v32 = vmul.f32 %v1266_v27, %v1266_v27  ;;  %v104_v34 = vld [vmem:[#allocation7 + $0x88] sm:$0xff]  ;;  %v166_v36 = vmul.f32 %v1252_v19, %v1252_v19  ;;  %v172_v37 = vadd.f32 %v164_v23, %v163_v20  ;;  %v135_v39 = vld [vmem:[#allocation7 + $0x180] sm:$0xff]  ;;  %v411_v43 = vmul.f32 %v1268_v29, %v1268_v29  ;;  %v105_v53 = vld [vmem:[#allocation7 + $0x90] sm:$0xff] }
  0x3e   :  { %v168_v35 = vadd.f32 %v167_v22, %v161_v16  ;;  %v1278_v38 = vpack.c.bf16 %v104_v34, %v103_v33  ;;  %v136_v40 = vld [vmem:[#allocation7 + $0x188] sm:$0xff]  ;;  %v87_v41 = vld [vmem:[#allocation7] sm:$0xff]  ;;  %v414_v42 = vadd.f32 %v413_v28, %v407_v14  ;;  %v417_v44 = vadd.f32 %v409_v31, %v408_v30  ;;  %v106_v54 = vld [vmem:[#allocation7 + $0x98] sm:$0xff]  ;;  %p1117_p0 = pnand %p1116_p13, %p1110_p10 }
  0x3f   :  { %v1282_v45 = vpack.c.bf16 %v136_v40, %v135_v39  ;;  %v88_v46 = vld [vmem:[#allocation7 + $0x8] sm:$0xff]  ;;  %v119_v47 = vld [vmem:[#allocation7 + $0x100] sm:$0xff]  ;;  %v173_v50 = vadd.f32 %v172_v37, %v165_v24  ;;  %v137_v55 = vld [vmem:[#allocation7 + $0x190] sm:$0xff]  ;;  %v1290_v57 = vpack.c.bf16 %v106_v54, %v105_v53 }
  0x40   :  { %v120_v48 = vld [vmem:[#allocation7 + $0x108] sm:$0xff]  ;;  %v169_v49 = vadd.f32 %v168_v35, %v162_v21  ;;  %865 = vmatprep.subr.bf16.mxu0 %v1278_v38  ;;  %v1285_v51 = vpack.c.bf16 %v88_v46, %v87_v41  ;;  %415 = vadd.xlane.f32.xlu1 %v414_v42  ;;  %v418_v56 = vadd.f32 %v417_v44, %v410_v32  ;;  %v138_v58 = vld [vmem:[#allocation7 + $0x198] sm:$0xff]  ;;  %v89_v59 = vld [vmem:[#allocation7 + $0x10] sm:$0xff] }
  0x41   :  { %v1287_v52 = vpack.c.bf16 %v120_v48, %v119_v47  ;;  %897 = vmatprep.subr.bf16.mxu1 %v1282_v45  ;;  %v90_v60 = vld [vmem:[#allocation7 + $0x18] sm:$0xff]  ;;  %v174_v61 = vadd.f32 %v173_v50, %v166_v36  ;;  %v1293_v62 = vpack.c.bf16 %v138_v58, %v137_v55  ;;  %v121_v4 = vld [vmem:[#allocation7 + $0x110] sm:$0xff]  ;;  %v107_v6 = vld [vmem:[#allocation7 + $0xa0] sm:$0xff] }
  0x42   :  { %170 = vadd.xlane.f32.xlu0 %v169_v49  ;;  %867 = vmatpush3.bf16.msra.mxu0 %v1285_v51  ;;  %v1295_v63 = vpack.c.bf16 %v90_v60, %v89_v59  ;;  %v122_v5 = vld [vmem:[#allocation7 + $0x118] sm:$0xff]  ;;  %v419_v11 = vadd.f32 %v418_v56, %v411_v43  ;;  %v108_v14 = vld [vmem:[#allocation7 + $0xa8] sm:$0xff]  ;;  %v139_v15 = vld [vmem:[#allocation7 + $0x1a0] sm:$0xff] }
  0x43   :  { %899 = vmatpush3.bf16.msra.mxu1 %v1287_v52  ;;  %869 = vmatprep.subr.bf16.mxu0 %v1290_v57  ;;  %v1299_v12 = vpack.c.bf16 %v122_v5, %v121_v4  ;;  %v140_v16 = vld [vmem:[#allocation7 + $0x1a8] sm:$0xff]  ;;  %v1302_v20 = vpack.c.bf16 %v108_v14, %v107_v6  ;;  %v91_v22 = vld [vmem:[#allocation7 + $0x20] sm:$0xff]  ;;  %v109_v30 = vld [vmem:[#allocation7 + $0xb0] sm:$0xff] }
  0x44   :  { %901 = vmatprep.subr.bf16.mxu1 %v1293_v62  ;;  %v1304_v21 = vpack.c.bf16 %v140_v16, %v139_v15  ;;  %v92_v23 = vld [vmem:[#allocation7 + $0x28] sm:$0xff]  ;;  %v123_v24 = vld [vmem:[#allocation7 + $0x120] sm:$0xff]  ;;  %420 = vadd.xlane.f32.xlu1 %v419_v11  ;;  %v110_v31 = vld [vmem:[#allocation7 + $0xb8] sm:$0xff] }
  0x45   :  { %v124_v28 = vld [vmem:[#allocation7 + $0x128] sm:$0xff]  ;;  %v1307_v32 = vpack.c.bf16 %v92_v23, %v91_v22  ;;  %v141_v33 = vld [vmem:[#allocation7 + $0x1b0] sm:$0xff]  ;;  %v142_v34 = vld [vmem:[#allocation7 + $0x1b8] sm:$0xff]  ;;  %v1313_v36 = vpack.c.bf16 %v110_v31, %v109_v30 }
  0x46   :  { %175 = vadd.xlane.f32.xlu0 %v174_v61  ;;  %871 = vmatpush3.bf16.msra.mxu0 %v1295_v63  ;;  %v1311_v35 = vpack.c.bf16 %v124_v28, %v123_v24  ;;  %v93_v37 = vld [vmem:[#allocation7 + $0x30] sm:$0xff]  ;;  %v94_v39 = vld [vmem:[#allocation7 + $0x38] sm:$0xff]  ;;  %v1316_v40 = vpack.c.bf16 %v142_v34, %v141_v33  ;;  %v111_v46 = vld [vmem:[#allocation7 + $0xc0] sm:$0xff] }
  0x47   :  { %903 = vmatpush3.bf16.msra.mxu1 %v1299_v12  ;;  %873 = vmatprep.subr.bf16.mxu0 %v1302_v20  ;;  %v125_v41 = vld [vmem:[#allocation7 + $0x130] sm:$0xff]  ;;  %v126_v42 = vld [vmem:[#allocation7 + $0x138] sm:$0xff]  ;;  %v1319_v43 = vpack.c.bf16 %v94_v39, %v93_v37  ;;  %v112_v47 = vld [vmem:[#allocation7 + $0xc8] sm:$0xff] }
  0x48   :  { %905 = vmatprep.subr.bf16.mxu1 %v1304_v21  ;;  %v1323_v44 = vpack.c.bf16 %v126_v42, %v125_v41  ;;  %v143_v48 = vld [vmem:[#allocation7 + $0x1c0] sm:$0xff]  ;;  %v1326_v49 = vpack.c.bf16 %v112_v47, %v111_v46  ;;  %v144_v50 = vld [vmem:[#allocation7 + $0x1c8] sm:$0xff]  ;;  %v113_v61 = vld [vmem:[#allocation7 + $0xd0] sm:$0xff] }
  0x49   :  { %v95_v53 = vld [vmem:[#allocation7 + $0x40] sm:$0xff]  ;;  %v96_v54 = vld [vmem:[#allocation7 + $0x48] sm:$0xff]  ;;  %v1329_v55 = vpack.c.bf16 %v144_v50, %v143_v48  ;;  %v114_v4 = vld [vmem:[#allocation7 + $0xd8] sm:$0xff] }
  0x4a   :  { %875 = vmatpush3.bf16.msra.mxu0 %v1307_v32  ;;  %v1331_v56 = vpack.c.bf16 %v96_v54, %v95_v53  ;;  %v127_v58 = vld [vmem:[#allocation7 + $0x140] sm:$0xff]  ;;  %v128_v59 = vld [vmem:[#allocation7 + $0x148] sm:$0xff]  ;;  %v145_v5 = vld [vmem:[#allocation7 + $0x1d0] sm:$0xff]  ;;  %v1338_v6 = vpack.c.bf16 %v114_v4, %v113_v61 }
  0x4b   :  { %907 = vmatpush3.bf16.msra.mxu1 %v1311_v35  ;;  %877 = vmatprep.subr.bf16.mxu0 %v1313_v36  ;;  %v1335_v60 = vpack.c.bf16 %v128_v59, %v127_v58  ;;  %v146_v11 = vld [vmem:[#allocation7 + $0x1d8] sm:$0xff]  ;;  %v97_v14 = vld [vmem:[#allocation7 + $0x50] sm:$0xff]  ;;  %v115_v30 = vld [vmem:[#allocation7 + $0xe0] sm:$0xff] }
  0x4c   :  { %909 = vmatprep.subr.bf16.mxu1 %v1316_v40  ;;  %v98_v15 = vld [vmem:[#allocation7 + $0x58] sm:$0xff]  ;;  %v1341_v16 = vpack.c.bf16 %v146_v11, %v145_v5  ;;  %v129_v23 = vld [vmem:[#allocation7 + $0x150] sm:$0xff]  ;;  %v116_v31 = vld [vmem:[#allocation7 + $0xe8] sm:$0xff] }
  0x4d   :  { %v1343_v22 = vpack.c.bf16 %v98_v15, %v97_v14  ;;  %v130_v24 = vld [vmem:[#allocation7 + $0x158] sm:$0xff]  ;;  %v147_v33 = vld [vmem:[#allocation7 + $0x1e0] sm:$0xff]  ;;  %v1350_v34 = vpack.c.bf16 %v116_v31, %v115_v30  ;;  %v148_v37 = vld [vmem:[#allocation7 + $0x1e8] sm:$0xff] }
  0x4e   :  { %879 = vmatpush3.bf16.msra.mxu0 %v1319_v43  ;;  %v1347_v28 = vpack.c.bf16 %v130_v24, %v129_v23  ;;  %v99_v39 = vld [vmem:[#allocation7 + $0x60] sm:$0xff]  ;;  %v100_v41 = vld [vmem:[#allocation7 + $0x68] sm:$0xff]  ;;  %v1353_v42 = vpack.c.bf16 %v148_v37, %v147_v33  ;;  %v117_v50 = vld [vmem:[#allocation7 + $0xf0] sm:$0xff]  ;;  %v1144_v33 = vmov 0  }
  0x4f   :  { %911 = vmatpush3.bf16.msra.mxu1 %v1323_v44  ;;  %881 = vmatprep.subr.bf16.mxu0 %v1326_v49  ;;  %v1355_v46 = vpack.c.bf16 %v100_v41, %v99_v39  ;;  %v131_v47 = vld [vmem:[#allocation7 + $0x160] sm:$0xff]  ;;  %v132_v48 = vld [vmem:[#allocation7 + $0x168] sm:$0xff]  ;;  %v118_v54 = vld [vmem:[#allocation7 + $0xf8] sm:$0xff] }
  0x50   :  { %913 = vmatprep.subr.bf16.mxu1 %v1329_v55  ;;  %v1359_v53 = vpack.c.bf16 %v132_v48, %v131_v47  ;;  %v149_v58 = vld [vmem:[#allocation7 + $0x1f0] sm:$0xff]  ;;  %v150_v59 = vld [vmem:[#allocation7 + $0x1f8] sm:$0xff]  ;;  %v1362_v61 = vpack.c.bf16 %v118_v54, %v117_v50  ;;  %v1381_v30 = vld [vmem:[%s1495_s3] sm:$0xff]  ;;  %1009 = vset.pattern.permute.xlu0 %v1144_v33 }
  0x51   :  { %v1364_v4 = vpack.c.bf16 %v150_v59, %v149_v58  ;;  %v101_v5 = vld [vmem:[#allocation7 + $0x70] sm:$0xff]  ;;  %v102_v11 = vld [vmem:[#allocation7 + $0x78] sm:$0xff]  ;;  %v1386_v31 = vld [vmem:[%s1495_s3 + $0x8] sm:$0xff]  ;;  %1010 = vset.pattern.permute.xlu1 %v1144_v33  ;;  %vm71_vm5 = vcmp.eq.s32.totalorder %v1381_v30, 0  ;;  %s1146_s3 = smov 127  }
  0x52   :  { %883 = vmatpush3.bf16.msra.mxu0 %v1331_v56  ;;  %v133_v14 = vld [vmem:[#allocation7 + $0x170] sm:$0xff]  ;;  %v134_v15 = vld [vmem:[#allocation7 + $0x178] sm:$0xff]  ;;  %v1367_v23 = vpack.c.bf16 %v102_v11, %v101_v5  ;;  %vm72_vm6 = vcmp.eq.s32.totalorder %v1386_v31, 0 }
  0x53   :  { %915 = vmatpush3.bf16.msra.mxu1 %v1335_v60  ;;  %885 = vmatprep.subr.bf16.mxu0 %v1338_v6  ;;  %v1371_v24 = vpack.c.bf16 %v134_v15, %v133_v14 }
  0x54   :  { %917 = vmatprep.subr.bf16.mxu1 %v1341_v16 }
  0x55   :  { %67 = vperm.xlu1 %1010, %v1386_v31  }
  0x56   :  { %887 = vmatpush3.bf16.msra.mxu0 %v1343_v22 }
  0x57   :  { %919 = vmatpush3.bf16.msra.mxu1 %v1347_v28  ;;  %889 = vmatprep.subr.bf16.mxu0 %v1350_v34 }
  0x58   :  { %921 = vmatprep.subr.bf16.mxu1 %v1353_v42 }
  0x5a   :  { %891 = vmatpush3.bf16.msra.mxu0 %v1355_v46 }
  0x5b   :  { %923 = vmatpush3.bf16.msra.mxu1 %v1359_v53  ;;  %893 = vmatprep.subr.bf16.mxu0 %v1362_v61 }
  0x5c   :  { %925 = vmatprep.subr.bf16.mxu1 %v1364_v4  ;;  %64 = vperm.xlu0 %1009, %v1381_v30  }
  0x5e   :  { %895 = vmatpush3.bf16.msra.mxu0 %v1367_v23 }
  0x5f   :  { %927 = vmatpush3.bf16.msra.mxu1 %v1371_v24  ;;  %929 = vmatprep.subr.bf16.mxu0 %v1278_v38 }
  0x60   :  { %961 = vmatprep.subr.bf16.mxu1 %v1282_v45 }
  0xcd   :  { %v416_v38 = vpop.xlane.xlu1 %415 }
  0xce   :  { %v422_v37 = vmax.f32 %v416_v38, 1e-24 }
  0xcf   :  { %v171_v45 = vpop.xlane.xlu0 %170 }
  0xd0   :  { %v177_v39 = vmax.f32 %v171_v45, 1e-24  ;;  %1011 = vrsqrt.f32 %v422_v37 }
  0xd1   :  { %v421_v41 = vpop.xlane.xlu1 %420 }
  0xd2   :  { %1013 = vrsqrt.f32 %v177_v39  ;;  %v423_v48 = vmax.f32 %v421_v41, 1e-24 }
  0xd3   :  { %v176_v47 = vpop.xlane.xlu0 %175 }
  0xd4   :  { %v178_v50 = vmax.f32 %v176_v47, 1e-24  ;;  %1015 = vrsqrt.f32 %v423_v48 }
  0xd6   :  { %1017 = vrsqrt.f32 %v178_v50 }
  0xda   :  { %v1012_v54 = vpop.eup %1011 }
  0xdb   :  { %v427_v59 = vmul.f32 %v1012_v54, %v1218_v1  ;;  %v429_v5 = vmul.f32 %v1012_v54, %v1222_v3  ;;  %v1393_v11 = vmul.f32 %v1012_v54, %v1216_v0  ;;  %v1400_v37 = vmul.f32 %v1012_v54, %v1220_v2 }
  0xdc   :  { %v1014_v58 = vpop.eup %1013 }
  0xdd   :  { %v182_v14 = vmul.f32 %v1014_v58, %v1232_v8  ;;  %v184_v15 = vmul.f32 %v1014_v58, %v1236_v10  ;;  %v181_v33 = vmul.f32 %v1014_v58, %v1230_v7  ;;  %v183_v38 = vmul.f32 %v1014_v58, %v1234_v9 }
  0xde   :  { %v1016_v45 = vpop.eup %1015 }
  0xdf   :  { %253 = vmatprep.mubr.f32.mxu0 %v182_v14  ;;  %v641_v39 = vsub.f32 %v182_v14, %v427_v59  ;;  %328 = vmatprep.mubr.f32.mxu1 %v184_v15  ;;  %v643_v1 = vsub.f32 %v184_v15, %v429_v5  ;;  %v640_v3 = vsub.f32 %v181_v33, %v1393_v11 }
  0xe0   :  { %v1018_v0 = vpop.eup %1017  ;;  %254 = vmatmul.mubr.f32.vlgmr.msra.gmra.mrb[0].mxu0 %v181_v33  ;;  %329 = vmatmul.mubr.f32.vlgmr.msra.gmra.mrb[0].mxu1 %v183_v38  ;;  %v1404_v8 = vmul.f32 %v1016_v45, %v1264_v26  ;;  %v1407_v7 = vmul.f32 %v1016_v45, %v1268_v29  ;;  %v1410_v9 = vmul.f32 %v1016_v45, %v1262_v25 }
  0xe1   :  { %v649_v2 = vmul.f32 %v641_v39, %v641_v39  ;;  %v648_v10 = vmul.f32 %v640_v3, %v640_v3  ;;  %931 = vmatpush3.bf16.msra.mxu0 %v1285_v51  ;;  %963 = vmatpush3.bf16.msra.mxu1 %v1287_v52  ;;  %v186_v41 = vmul.f32 %v1018_v0, %v1248_v17 }
  0xe2   :  { %v188_v47 = vmul.f32 %v1018_v0, %v1252_v19  ;;  %933 = vmatprep.subr.bf16.mxu0 %v1290_v57  ;;  %965 = vmatprep.subr.bf16.mxu1 %v1293_v62  ;;  %v185_v26 = vmul.f32 %v1018_v0, %v1242_v13  ;;  %v187_v29 = vmul.f32 %v1018_v0, %v1250_v18 }
  0xe3   :  { %258 = vmatprep.mubr.f32.mxu0 %v186_v41  ;;  %v645_v25 = vsub.f32 %v186_v41, %v1404_v8  ;;  %v432_v48 = vmul.f32 %v1016_v45, %v1266_v27  ;;  %v642_v51 = vsub.f32 %v183_v38, %v1400_v37  ;;  %v656_v19 = vadd.f32 %v649_v2, %v648_v10 }
  0xe4   :  { %333 = vmatprep.mubr.f32.mxu1 %v188_v47  ;;  %259 = vmatmul.mubr.f32.gmra.mrb[2].mxu0 %v185_v26  ;;  %v644_v17 = vsub.f32 %v185_v26, %v1410_v9  ;;  %v647_v52 = vsub.f32 %v188_v47, %v1407_v7  ;;  %v651_v62 = vmul.f32 %v643_v1, %v643_v1 }
  0xe5   :  { %334 = vmatmul.mubr.f32.gmra.mrb[2].mxu1 %v187_v29  ;;  %935 = vmatpush3.bf16.msra.mxu0 %v1295_v63  ;;  %v653_v13 = vmul.f32 %v645_v25, %v645_v25  ;;  %v650_v57 = vmul.f32 %v642_v51, %v642_v51  ;;  %v646_v18 = vsub.f32 %v187_v29, %v432_v48 }
  0xe6   :  { %967 = vmatpush3.bf16.msra.mxu1 %v1299_v12  ;;  %937 = vmatprep.subr.bf16.mxu0 %v1302_v20  ;;  %v652_v27 = vmul.f32 %v644_v17, %v644_v17  ;;  %v655_v58 = vmul.f32 %v647_v52, %v647_v52 }
  0xe7   :  { %969 = vmatprep.subr.bf16.mxu1 %v1304_v21  ;;  %498 = vmatprep.mubr.f32.mxu0 %v427_v59  ;;  %v657_v50 = vadd.f32 %v656_v19, %v650_v57  ;;  %v654_v54 = vmul.f32 %v646_v18, %v646_v18  ;;  %v61_v21 = vlaneseq }
  0xe8   :  { %573 = vmatprep.mubr.f32.mxu1 %v429_v5  ;;  %v661_v14 = vadd.f32 %v653_v13, %v652_v27  ;;  %v1145_v27 = vmov 0.4  }
  0xe9   :  { %939 = vmatpush3.bf16.msra.mxu0 %v1307_v32  ;;  %v658_v63 = vadd.f32 %v657_v50, %v651_v62  ;;  %v1459_v32 = vand.u32 127, %v61_v21  ;;  %v73_v62 = vsel %vm71_vm5, 0.1, %v1145_v27  ;;  %v74_v50 = vsel %vm72_vm6, 0.1, %v1145_v27 }
  0xea   :  { %971 = vmatpush3.bf16.msra.mxu1 %v1311_v35  ;;  %941 = vmatprep.subr.bf16.mxu0 %v1313_v36  ;;  %v662_v12 = vadd.f32 %v661_v14, %v654_v54  ;;  %v65_v35 = vpop.permute.xlu0 %64 }
  0xeb   :  { %973 = vmatprep.subr.bf16.mxu1 %v1316_v40  ;;  %vm69_vm0 = vcmp.eq.s32.totalorder %v1459_v32, %v65_v35  ;;  %vm75_vm2 = vcmp.ge.s32.totalorder %v1459_v32, 1  ;;  %vm76_vm3 = vcmp.lt.s32.totalorder %v1459_v32, 10  ;;  %vm685_vm8 = vcmp.eq.s32.totalorder %v1459_v32, 1 }
  0xec   :  { %v1433_v20 = vadd.f32 %v662_v12, %v655_v58  ;;  %vm77_vm4 = vmand %vm75_vm2, %vm76_vm3  ;;  %vm681_vm10 = vcmp.eq.s32.totalorder %v1459_v32, 0  ;;  %vm690_vm12 = vcmp.eq.s32.totalorder %v1459_v32, 2 }
  0xed   :  { %943 = vmatpush3.bf16.msra.mxu0 %v1319_v43 }
  0xee   :  { %975 = vmatpush3.bf16.msra.mxu1 %v1323_v44  ;;  %945 = vmatprep.subr.bf16.mxu0 %v1326_v49 }
  0xef   :  { %977 = vmatprep.subr.bf16.mxu1 %v1329_v55 }
  0xf1   :  { %947 = vmatpush3.bf16.msra.mxu0 %v1331_v56 }
  0xf2   :  { %979 = vmatpush3.bf16.msra.mxu1 %v1335_v60  ;;  %949 = vmatprep.subr.bf16.mxu0 %v1338_v6  ;;  %v68_v6 = vpop.permute.xlu1 %67 }
  0xf3   :  { %981 = vmatprep.subr.bf16.mxu1 %v1341_v16  ;;  %vm70_vm1 = vcmp.eq.s32.totalorder %v1459_v32, %v68_v6 }
  0xf5   :  { %951 = vmatpush3.bf16.msra.mxu0 %v1343_v22 }
  0xf6   :  { %983 = vmatpush3.bf16.msra.mxu1 %v1347_v28  ;;  %953 = vmatprep.subr.bf16.mxu0 %v1350_v34 }
  0xf7   :  { %985 = vmatprep.subr.bf16.mxu1 %v1353_v42 }
  0xf9   :  { %955 = vmatpush3.bf16.msra.mxu0 %v1355_v46 }
  0xfa   :  { %987 = vmatpush3.bf16.msra.mxu1 %v1359_v53  ;;  %957 = vmatprep.subr.bf16.mxu0 %v1362_v61 }
  0xfb   :  { %989 = vmatprep.subr.bf16.mxu1 %v1364_v4 }
  0xfd   :  { %959 = vmatpush3.bf16.msra.mxu0 %v1367_v23 }
  0xfe   :  { %991 = vmatpush3.bf16.msra.mxu1 %v1371_v24 }
 0x100   :  { %499 = vmatmul.mubr.f32.vlgmr.msra.gmra.mrb[4].mxu0 %v1393_v11 }
 0x101   :  { %574 = vmatmul.mubr.f32.vlgmr.msra.gmra.mrb[4].mxu1 %v1400_v37  ;;  %503 = vmatprep.mubr.f32.mxu0 %v1404_v8 }
 0x102   :  { %578 = vmatprep.mubr.f32.mxu1 %v1407_v7 }
 0x104   :  { %504 = vmatmul.mubr.f32.gmra.mrb[6].mxu0 %v1410_v9 }
 0x105   :  { %579 = vmatmul.mubr.f32.gmra.mrb[6].mxu1 %v432_v48 }
 0x1b3   :  { %v744_v36 = vpop.f32.mrb[0].mxu0  ;;  %v782_v40 = vpop.f32.mrb[0].mxu1 }
 0x1b4   :  { %v745_v43 = vpop.f32.mrb[1].mxu0  ;;  %v783_v44 = vpop.f32.mrb[1].mxu1 }
 0x1b5   :  { %v746_v49 = vadd.f32 %v745_v43, %v744_v36  ;;  %v784_v55 = vadd.f32 %v783_v44, %v782_v40 }
 0x1b7   :  { %v747_v56 = vpop.f32.mrb[2].mxu0  ;;  %v331_v60 = vadd.f32 %v784_v55, %v746_v49 }
 0x1b8   :  { %v785_v16 = vpop.f32.mrb[2].mxu1  ;;  %v748_v22 = vpop.f32.mrb[3].mxu0 }
 0x1b9   :  { %v749_v28 = vadd.f32 %v748_v22, %v747_v56  ;;  %v786_v34 = vpop.f32.mrb[3].mxu1  ;;  %v339_v42 = vsel %vm69_vm0, %v331_v60, 0.0  ;;  %v349_v4 = vmul.f32 30.0, %v331_v60 }
 0x1ba   :  { %v787_v46 = vadd.f32 %v786_v34, %v785_v16  ;;  %341 = vadd.xlane.f32.xlu1 %v339_v42 }
 0x1bb   :  { %v351_v23 = vmul.f32 1.442695, %v349_v4 }
 0x1bc   :  { %v336_v53 = vadd.f32 %v787_v46, %v749_v28 }
 0x1bd   :  { %1019 = vpow2.f32 %v351_v23 }
 0x1be   :  { %v340_v61 = vsel %vm70_vm1, %v336_v53, 0.0  ;;  %v350_v24 = vmul.f32 30.0, %v336_v53 }
 0x1bf   :  { %343 = vadd.xlane.f32.xlu0 %v340_v61 }
 0x1c0   :  { %v353_v15 = vmul.f32 1.442695, %v350_v24 }
 0x1c2   :  { %1021 = vpow2.f32 %v353_v15 }
 0x1c3   :  { %659 = vadd.xlane.f32.xlu0 %v658_v63 }
 0x1c7   :  { %v1020_v29 = vpop.eup %1019 }
 0x1c8   :  { %v355_v48 = vsel %vm77_vm4, %v1020_v29, 0.0 }
 0x1cc   :  { %v1022_v51 = vpop.eup %1021 }
 0x1cd   :  { %v356_v17 = vsel %vm77_vm4, %v1022_v51, 0.0 }
 0x1d3   :  { %v820_v59 = vpop.f32.mrb[4].mxu0 }
 0x1d4   :  { %v858_v5 = vpop.f32.mrb[4].mxu1  ;;  %v821_v11 = vpop.f32.mrb[5].mxu0 }
 0x1d5   :  { %v822_v33 = vadd.f32 %v821_v11, %v820_v59  ;;  %v859_v38 = vpop.f32.mrb[5].mxu1 }
 0x1d6   :  { %v860_v37 = vadd.f32 %v859_v38, %v858_v5 }
 0x1d7   :  { %v823_v45 = vpop.f32.mrb[6].mxu0 }
 0x1d8   :  { %v861_v39 = vpop.f32.mrb[6].mxu1  ;;  %v824_v1 = vpop.f32.mrb[7].mxu0  ;;  %v576_v3 = vadd.f32 %v860_v37, %v822_v33 }
 0x1d9   :  { %v825_v0 = vadd.f32 %v824_v1, %v823_v45  ;;  %v862_v8 = vpop.f32.mrb[7].mxu1 }
 0x1da   :  { %v863_v7 = vadd.f32 %v862_v8, %v861_v39  ;;  %v584_v9 = vsel %vm69_vm0, %v576_v3, 0.0  ;;  %v594_v2 = vmul.f32 30.0, %v576_v3 }
 0x1db   :  { %586 = vadd.xlane.f32.xlu1 %v584_v9 }
 0x1dc   :  { %v596_v10 = vmul.f32 1.442695, %v594_v2  ;;  %v581_v41 = vadd.f32 %v863_v7, %v825_v0 }
 0x1de   :  { %1023 = vpow2.f32 %v596_v10  ;;  %v585_v47 = vsel %vm70_vm1, %v581_v41, 0.0  ;;  %v595_v26 = vmul.f32 30.0, %v581_v41 }
 0x1df   :  { %588 = vadd.xlane.f32.xlu1 %v585_v47 }
 0x1e0   :  { %v598_v25 = vmul.f32 1.442695, %v595_v26 }
 0x1e2   :  { %1025 = vpow2.f32 %v598_v25 }
 0x1e3   :  { %357 = vadd.xlane.f32.xlu1 %v355_v48 }
 0x1e7   :  { %359 = vadd.xlane.f32.xlu1 %v356_v17 }
 0x1e8   :  { %v1024_v19 = vpop.eup %1023 }
 0x1e9   :  { %v600_v52 = vsel %vm77_vm4, %v1024_v19, 0.0 }
 0x1eb   :  { %602 = vadd.xlane.f32.xlu1 %v600_v52 }
 0x1ec   :  { %v1026_v13 = vpop.eup %1025 }
 0x1ed   :  { %v601_v57 = vsel %vm77_vm4, %v1026_v13, 0.0 }
 0x1ef   :  { %604 = vadd.xlane.f32.xlu1 %v601_v57 }
 0x1f3   :  { %664 = vadd.xlane.f32.xlu1 %v1433_v20 }
 0x247   :  { %v342_v18 = vpop.xlane.xlu1 %341 }
 0x248   :  { %v345_v54 = vsub.f32 %v342_v18, %v73_v62 }
 0x24a   :  { %v347_v63 = vmul.f32 30.0, %v345_v54 }
 0x24c   :  { %v344_v58 = vpop.xlane.xlu0 %343  ;;  %v361_v35 = vmul.f32 1.442695, %v347_v63 }
 0x24d   :  { %v346_v14 = vsub.f32 %v344_v58, %v74_v50 }
 0x24e   :  { %1027 = vpow2.f32 %v361_v35 }
 0x24f   :  { %v348_v12 = vmul.f32 30.0, %v346_v14 }
 0x250   :  { %v660_v3 = vpop.xlane.xlu0 %659 }
 0x251   :  { %v363_v36 = vmul.f32 1.442695, %v348_v12  ;;  %v668_v51 = vsel %vm383_vm7, %v660_v3, 0.0 }
 0x253   :  { %1029 = vpow2.f32 %v363_v36 }
 0x258   :  { %v1028_v55 = vpop.eup %1027 }
 0x25d   :  { %v1030_v16 = vpop.eup %1029 }
 0x268   :  { %v587_v40 = vpop.xlane.xlu1 %586 }
 0x269   :  { %v590_v43 = vsub.f32 %v587_v40, %v73_v62 }
 0x26b   :  { %v592_v20 = vmul.f32 30.0, %v590_v43 }
 0x26c   :  { %v589_v44 = vpop.xlane.xlu1 %588 }
 0x26d   :  { %v606_v30 = vmul.f32 1.442695, %v592_v20  ;;  %v591_v49 = vsub.f32 %v589_v44, %v74_v50 }
 0x26f   :  { %1031 = vpow2.f32 %v606_v30  ;;  %v593_v31 = vmul.f32 30.0, %v591_v49 }
 0x270   :  { %v358_v56 = vpop.xlane.xlu1 %357 }
 0x271   :  { %v608_v60 = vmul.f32 1.442695, %v593_v31  ;;  %v365_v6 = vadd.f32 %v1028_v55, %v358_v56 }
 0x273   :  { %1033 = vpow2.f32 %v608_v60 }
 0x274   :  { %1035 = vlog2.f32 %v365_v6  ;;  %v360_v22 = vpop.xlane.xlu1 %359 }
 0x275   :  { %v366_v28 = vadd.f32 %v1030_v16, %v360_v22 }
 0x277   :  { %1037 = vlog2.f32 %v366_v28 }
 0x278   :  { %v603_v34 = vpop.xlane.xlu1 %602 }
 0x279   :  { %v1032_v42 = vpop.eup %1031 }
 0x27a   :  { %v610_v46 = vadd.f32 %v1032_v42, %v603_v34 }
 0x27c   :  { %1039 = vlog2.f32 %v610_v46  ;;  %v605_v53 = vpop.xlane.xlu1 %604 }
 0x27d   :  { %v1034_v61 = vpop.eup %1033 }
 0x27e   :  { %v1036_v4 = vpop.eup %1035  ;;  %v611_v23 = vadd.f32 %v1034_v61, %v605_v53 }
 0x27f   :  { %v368_v24 = vmul.f32 0.6931472, %v1036_v4 }
 0x280   :  { %1041 = vlog2.f32 %v611_v23  ;;  %v665_v0 = vpop.xlane.xlu1 %664 }
 0x281   :  { %v1038_v59 = vpop.eup %1037  ;;  %v371_v5 = vsub.f32 %v347_v63, %v368_v24  ;;  %v669_v48 = vsel %vm383_vm7, %v665_v0, 0.0 }
 0x282   :  { %v370_v11 = vmul.f32 0.6931472, %v1038_v59  ;;  %v670_v17 = vadd.f32 %v669_v48, %v668_v51 }
 0x283   :  { %377 = vrot.lane.b32.xlu0 %v371_v5, %s1146_s3 }
 0x284   :  { %v372_v15 = vsub.f32 %v348_v12, %v370_v11 }
 0x286   :  { %v1040_v33 = vpop.eup %1039  ;;  %379 = vrot.lane.b32.xlu1 %v372_v15, %s1146_s3 }
 0x287   :  { %v613_v38 = vmul.f32 0.6931472, %v1040_v33 }
 0x289   :  { %v616_v37 = vsub.f32 %v592_v20, %v613_v38 }
 0x28a   :  { %v1042_v45 = vpop.eup %1041 }
 0x28b   :  { %v615_v39 = vmul.f32 0.6931472, %v1042_v45  ;;  %622 = vrot.lane.b32.xlu1 %v616_v37, %s1146_s3 }
 0x28d   :  { %v617_v1 = vsub.f32 %v593_v31, %v615_v39  ;;  %v79_v31 = vshrl.u32 %v61_v21, 7 }
 0x28f   :  { %624 = vrot.lane.b32.xlu0 %v617_v1, %s1146_s3  ;;  %vm680_vm9 = vcmp.eq.s32.totalorder %v79_v31, 0 }
 0x290   :  { %vm686_vm11 = vmand %vm680_vm9, %vm685_vm8 }
 0x291   :  { %vm682_vm13 = vmand %vm680_vm9, %vm681_vm10 }
 0x292   :  { %vm691_vm14 = vmand %vm680_vm9, %vm690_vm12 }
 0x2f5   :  { %v378_v8 = vpop.permute.xlu0 %377 }
 0x2f6   :  { %v384_v9 = vsel %vm383_vm7, %v378_v8, 0.0 }
 0x2f8   :  { %v380_v7 = vpop.permute.xlu1 %379 }
 0x2f9   :  { %v385_v2 = vsel %vm383_vm7, %v380_v7, 0.0 }
 0x2fa   :  { %v386_v10 = vadd.f32 %v385_v2, %v384_v9 }
 0x2fc   :  { %387 = vadd.xlane.f32.xlu1 %v386_v10 }
 0x2fd   :  { %v623_v41 = vpop.permute.xlu1 %622 }
 0x2fe   :  { %v628_v26 = vsel %vm383_vm7, %v623_v41, 0.0 }
 0x301   :  { %v625_v47 = vpop.permute.xlu0 %624 }
 0x302   :  { %v629_v29 = vsel %vm383_vm7, %v625_v47, 0.0 }
 0x303   :  { %v630_v25 = vadd.f32 %v629_v29, %v628_v26 }
 0x305   :  { %631 = vadd.xlane.f32.xlu0 %v630_v25 }
 0x309   :  { %671 = vadd.xlane.f32.xlu0 %v670_v17 }
 0x389   :  { %v388_v19 = vpop.xlane.xlu1 %387 }
 0x38a   :  { %v389_v52 = vrot.slane %v388_v19, 4 }
 0x38c   :  { %v390_v13 = vadd.f32 %v389_v52, %v388_v19 }
 0x38e   :  { %v391_v57 = vrot.slane %v390_v13, 2 }
 0x390   :  { %v392_v18 = vadd.f32 %v391_v57, %v390_v13 }
 0x392   :  { %v632_v27 = vpop.xlane.xlu0 %631  ;;  %v393_v62 = vrot.slane %v392_v18, 1 }
 0x393   :  { %v633_v50 = vrot.slane %v632_v27, 4 }
 0x394   :  { %v394_v54 = vadd.f32 %v393_v62, %v392_v18 }
 0x395   :  { %v634_v58 = vadd.f32 %v633_v50, %v632_v27 }
 0x396   :  { %992 = vpush %v394_v54  ;;  %v672_v14 = vpop.xlane.xlu0 %671 }
 0x397   :  { %v635_v63 = vrot.slane %v634_v58, 2  ;;  %v673_v12 = vrot.slane %v672_v14, 4 }
 0x399   :  { %v674_v35 = vadd.f32 %v673_v12, %v672_v14  ;;  %v636_v36 = vadd.f32 %v635_v63, %v634_v58 }
 0x39b   :  { %v675_v40 = vrot.slane %v674_v35, 2  ;;  %v637_v43 = vrot.slane %v636_v36, 1 }
 0x39d   :  { %v676_v20 = vadd.f32 %v675_v40, %v674_v35  ;;  %v638_v44 = vadd.f32 %v637_v43, %v636_v36 }
 0x39f   :  { %994 = vpush %v638_v44  ;;  %v677_v30 = vrot.slane %v676_v20, 1 }
 0x3a1   :  { %v678_v49 = vadd.f32 %v677_v30, %v676_v20 }
 0x3a3   :  { %996 = vpush %v678_v49 }
 0x3c7   :  { %s993_s30 = spop %992 }
 0x3c8   :  { %v683_v55 = vstv %s993_s30 }
 0x3c9   :  { %v684_v6 = vsel %vm682_vm13, %v683_v55, 0.0 }
 0x3d0   :  { %s995_s5 = spop %994 }
 0x3d1   :  { %v687_v56 = vstv %s995_s5 }
 0x3d2   :  { %v688_v60 = vsel %vm686_vm11, %v687_v56, 0.0 }
 0x3d3   :  { %v689_v21 = vadd.f32 %v688_v60, %v684_v6 }
 0x3d4   :  { %s997_s6 = spop %996 }
 0x3d5   :  { %v692_v16 = vstv %s997_s6 }
 0x3d6   :  { %v693_v22 = vsel %vm691_vm14, %v692_v16, 0.0 }
 0x3d7   :  { %v694_v28 = vadd.f32 %v693_v22, %v689_v21 }
 0x3d9   :  { %695 = vst [vmem:[#allocation8] sm:$0xff] %v694_v28 }
 0x3da   :  { %1120 = shalt.err (!%p1117_p0)
}
 0x3db   :  { %s1121_s12 = scalar_lea.hbm %s1496_s4, 128 }
 0x3dc   :  { %p1122_p1 = scmp.ne.s32.totalorder %s1496_s4, %s1121_s12  ;;  %p1125_p2 = scmp.lt.u32.totalorder %s1121_s12, %s1496_s4 }
 0x3de   :  { %p1127_p3 = pnand %p1125_p2, %p1122_p1 }
 0x3e0   :  { %1130 = shalt.err (!%p1127_p3)
}
 0x3e1   :  { %705 = dma.vmem_to_hbm [thread:$0]  %s703_s8, 128, %s1496_s4, [#allocation4]  }
 0x3e2   :  { %1135 = dma.done.wait [#allocation4], 128  }
 0x3e3   :  { %1136 = vsyncadd [#allocation4], 4294967168 }
 0x3e4   :  { %709 = vsyncpa [#allocation3], 1 }
 0x3e5   :  { %710 = vsyncpa [#allocation6], 1 }
 0x3e6   :  { %711 = vsyncpa [#allocation4], 1 }

</bundles_post_ra>
